<compile_context>
chip_gen: v6e
topology: v6e:2x2x1
jax: 0.10.0
libtpu: 0.0.40
codegen_flags: <defaults>
</compile_context>

<pallas_src>
import functools

import jax
import jax.numpy as jnp
from jax.experimental import pallas as pl
from jax.experimental.pallas import tpu as pltpu


HIDDEN = 64


def _cdiv(a, b):
    return -(-a // b)


def _round_up(x, m):
    return _cdiv(x, m) * m


def _mish_fast(x, *, bf16_exp=False):
    # mish(x) = x * tanh(softplus(x)) = x * n / (n + 2), with n = e^x (e^x + 2).
    # Clamp the exp argument at 20 (e^40 would overflow f32); beyond the clamp
    # n/(n+2) == 1 in f32, so the result is already ~x and no select is needed.
    xc = jnp.minimum(x, 20.0)
    if bf16_exp:
        # v6e/v7x only: bf16 EUP has ~2x throughput; rel-err grows to ~3e-3.
        e = jnp.exp(xc.astype(jnp.bfloat16)).astype(jnp.float32)
    else:
        e = jnp.exp(xc)
    n = e * (e + 2.0)
    # Approximate EUP reciprocal (single op) instead of a full f32 divide
    # (reciprocal + Newton-Raphson refinement).  Rel-err ~2^-12.
    return x * n * pl.reciprocal(n + 2.0, approx=True)


def critic_kernel(xT_ref, w1_ref, b1_ref, w2_ref, b2_ref, w3_ref, b3_ref,
                  o_ref, *, bf16_exp):
    xT = xT_ref[...]                                              # [state_dim, TB]

    # layer 1: Linear(state_dim, 64) + Mish   -> [64, TB] (lane-dense)
    h1 = jnp.dot(w1_ref[...], xT, preferred_element_type=jnp.float32) + b1_ref[...]
    h1 = _mish_fast(h1, bf16_exp=bf16_exp)

    # layer 2: Linear(64, 64) + Mish          -> [64, TB]
    h2 = jnp.dot(w2_ref[...], h1, preferred_element_type=jnp.float32) + b2_ref[...]
    h2 = _mish_fast(h2, bf16_exp=bf16_exp)

    # layer 3: Linear(64, 1)                  -> [1, TB]
    # TODO(synk): if bundle profiling ever shows MXU vpop on the critical path,
    # move the K=3 / M=1 matmuls to VPU broadcast-MAC / XLU reduce; EUP is the
    # bottleneck today so this stays on the MXU.
    v = jnp.dot(w3_ref[...], h2, preferred_element_type=jnp.float32) + b3_ref[...]
    o_ref[...] = v.astype(o_ref.dtype)


@functools.partial(jax.jit, static_argnames=("block_b", "min_tiles", "bf16_exp"))
def critic_forward(x, params, *, block_b=4096, min_tiles=2, bf16_exp=False):
    """x: [B, state_dim] float32.  Returns [B, 1] float32 value estimates.

    block_b:  cap on lane-tile width (raise to 8192 on single-TC v5e/v6e).
    min_tiles: minimum grid steps for batches >= 512 (2 feeds v7x's two TCs).
    """
    w1, b1, w2, b2, w3, b3 = params
    B, state_dim = x.shape
    H = w1.shape[0]

    if B == 0:  # empty-batch edge case: avoid an empty grid
        return jnp.zeros((0, 1), jnp.float32)

    # Pick the grid-step count first, then balance the tile width (keeps
    # padding < 128 columns/tile rather than rounding B up to a fixed TB).
    num_tiles = _cdiv(B, block_b)
    if B >= 256 * min_tiles:          # enough columns to be worth splitting
        num_tiles = max(num_tiles, min_tiles)
    TB = _round_up(_cdiv(B, num_tiles), 128)
    B_pad = TB * num_tiles

    # Interface shim only (see module docstring): pad + transpose to [state_dim, B_pad].
    xT = jnp.pad(x.T, ((0, 0), (0, B_pad - B)))

    kernel = functools.partial(critic_kernel, bf16_exp=bf16_exp)

    out = pl.pallas_call(
        kernel,
        out_shape=jax.ShapeDtypeStruct((1, B_pad), jnp.float32),
        grid=(num_tiles,),
        in_specs=[
            pl.BlockSpec((state_dim, TB), lambda i: (0, i)),  # x^T : blocked on lanes
            pl.BlockSpec((H, state_dim), lambda i: (0, 0)),   # W1  : resident in VMEM
            pl.BlockSpec((H, 1), lambda i: (0, 0)),           # b1
            pl.BlockSpec((H, H), lambda i: (0, 0)),           # W2
            pl.BlockSpec((H, 1), lambda i: (0, 0)),           # b2
            pl.BlockSpec((1, H), lambda i: (0, 0)),           # W3
            pl.BlockSpec((1, 1), lambda i: (0, 0)),           # b3
        ],
        out_specs=pl.BlockSpec((1, TB), lambda i: (0, i)),
        compiler_params=pltpu.CompilerParams(
            dimension_semantics=("parallel",),                # megacore on v7x
        ),
    )(xT, w1, b1, w2, b2, w3, b3)

    # Interface shim only: slice off padded columns, back to [B, 1].
    return out[0, :B].reshape(B, 1)


def init_params(key, state_dim, hidden=HIDDEN):
    """PyTorch nn.Linear-style init (U(-1/sqrt(fan_in), +)), stored [out, in]."""
    def linear(key, fan_in, fan_out):
        kw, kb = jax.random.split(key)
        bound = 1.0 / jnp.sqrt(fan_in)
        w = jax.random.uniform(kw, (fan_out, fan_in), jnp.float32, -bound, bound)
        b = jax.random.uniform(kb, (fan_out, 1), jnp.float32, -bound, bound)
        return w, b

    k1, k2, k3 = jax.random.split(key, 3)
    w1, b1 = linear(k1, state_dim, hidden)
    w2, b2 = linear(k2, hidden, hidden)
    w3, b3 = linear(k3, hidden, 1)
    return (w1, b1, w2, b2, w3, b3)


def _mish_ref(x):
    # reference mish matching torch: x * tanh(softplus(x)), stable softplus
    sp = jnp.log1p(jnp.exp(-jnp.abs(x))) + jnp.maximum(x, 0.0)
    return x * jnp.tanh(sp)


def critic_reference(x, params):
    """Pure-JAX reference (PyTorch semantics) for correctness checking."""
    w1, b1, w2, b2, w3, b3 = params
    h1 = _mish_ref(x @ w1.T + b1.T)
    h2 = _mish_ref(h1 @ w2.T + b2.T)
    return h2 @ w3.T + b3.T


if __name__ == "__main__":
    key = jax.random.PRNGKey(0)
    kx, kx2, kp = jax.random.split(key, 3)

    state_dim = 3  # Pendulum-v1 observation dim
    params = init_params(kp, state_dim)

    # Tolerance reflects the exp-based Mish reformulation + approximate EUP
    # reciprocal (rel-err ~2^-12) vs the exact log1p+tanh torch formulation.
    ATOL = RTOL = 1e-3

    # Small-batch path (single tile, grid=(1,)).
    batch = 8
    x = jax.random.normal(kx, (batch, state_dim), jnp.float32)
    out = jax.block_until_ready(critic_forward(x, params))
    ref = critic_reference(x, params)
    assert out.shape == (batch, 1), out.shape
    assert jnp.allclose(out, ref, atol=ATOL, rtol=RTOL), (out, ref)

    # Multi-tile path (grid=(2,), exercises lane-blocked x / out index maps).
    batch2 = 512
    x2 = jax.random.normal(kx2, (batch2, state_dim), jnp.float32)
    out2 = jax.block_until_ready(critic_forward(x2, params))
    ref2 = critic_reference(x2, params)
    assert out2.shape == (batch2, 1), out2.shape
    assert jnp.allclose(out2, ref2, atol=ATOL, rtol=RTOL)

    print("KERNEL_OK")
</pallas_src>

<mosaic_0001>
module attributes {stable_mosaic.version = 11 : i64} {
  func.func @critic_kernel(%arg0: i32, %arg1: memref<3x128xf32, #tpu.memory_space<vmem>>, %arg2: memref<64x3xf32, #tpu.memory_space<vmem>>, %arg3: memref<64x1xf32, #tpu.memory_space<vmem>>, %arg4: memref<64x64xf32, #tpu.memory_space<vmem>>, %arg5: memref<64x1xf32, #tpu.memory_space<vmem>>, %arg6: memref<1x64xf32, #tpu.memory_space<vmem>>, %arg7: memref<1x1xf32, #tpu.memory_space<vmem>>, %arg8: memref<1x128xf32, #tpu.memory_space<vmem>>) attributes {dimension_semantics = [#tpu.dimension_semantics<parallel>], iteration_bounds = array<i64: 1>, scalar_prefetch = 0 : i64, scratch_operands = 0 : i64, tpu.core_type = #tpu.core_type<tc>, window_params = [{transform_indices = @transform_0, window_bounds = array<i64: 3, 128>}, {pipeline_mode = #tpu.pipeline_mode<synchronous>, transform_indices = @transform_1, window_bounds = array<i64: 64, 3>}, {pipeline_mode = #tpu.pipeline_mode<synchronous>, transform_indices = @transform_2, window_bounds = array<i64: 64, 1>}, {pipeline_mode = #tpu.pipeline_mode<synchronous>, transform_indices = @transform_3, window_bounds = array<i64: 64, 64>}, {pipeline_mode = #tpu.pipeline_mode<synchronous>, transform_indices = @transform_4, window_bounds = array<i64: 64, 1>}, {pipeline_mode = #tpu.pipeline_mode<synchronous>, transform_indices = @transform_5, window_bounds = array<i64: 1, 64>}, {pipeline_mode = #tpu.pipeline_mode<synchronous>, transform_indices = @transform_6, window_bounds = array<i64: 1, 1>}, {transform_indices = @transform_7, window_bounds = array<i64: 1, 128>}]} {
    %c0 = arith.constant 0 : index
    %c0_0 = arith.constant 0 : index
    %0 = vector.load %arg1[%c0, %c0_0] : memref<3x128xf32, #tpu.memory_space<vmem>>, vector<3x128xf32>
    %c0_1 = arith.constant 0 : index
    %c0_2 = arith.constant 0 : index
    %1 = vector.load %arg2[%c0_1, %c0_2] : memref<64x3xf32, #tpu.memory_space<vmem>>, vector<64x3xf32>
    %cst = arith.constant dense<0.000000e+00> : vector<64x128xf32>
    %2 = tpu.matmul %1, %0, %cst {dimension_numbers = #tpu.dot_dimension_numbers<[1], [0], [0], [1], [0, 0, 1, 1], [], []>} : vector<64x3xf32>, vector<3x128xf32>, vector<64x128xf32> -> vector<64x128xf32>
    %c0_3 = arith.constant 0 : index
    %c0_4 = arith.constant 0 : index
    %3 = vector.load %arg3[%c0_3, %c0_4] : memref<64x1xf32, #tpu.memory_space<vmem>>, vector<64x1xf32>
    %4 = vector.broadcast %3 : vector<64x1xf32> to vector<64x128xf32>
    %5 = arith.addf %2, %4 : vector<64x128xf32>
    %cst_5 = arith.constant 2.000000e+01 : f32
    %6 = vector.broadcast %cst_5 : f32 to vector<64x128xf32>
    %7 = arith.minimumf %5, %6 : vector<64x128xf32>
    %8 = math.exp %7 : vector<64x128xf32>
    %cst_6 = arith.constant 2.000000e+00 : f32
    %9 = vector.broadcast %cst_6 : f32 to vector<64x128xf32>
    %10 = arith.addf %8, %9 : vector<64x128xf32>
    %11 = arith.mulf %8, %10 : vector<64x128xf32>
    %12 = arith.mulf %5, %11 : vector<64x128xf32>
    %cst_7 = arith.constant 2.000000e+00 : f32
    %13 = vector.broadcast %cst_7 : f32 to vector<64x128xf32>
    %14 = arith.addf %11, %13 : vector<64x128xf32>
    %15 = tpu.reciprocal %14 {approx = true} : vector<64x128xf32> -> vector<64x128xf32>
    %16 = arith.mulf %12, %15 : vector<64x128xf32>
    %c0_8 = arith.constant 0 : index
    %c0_9 = arith.constant 0 : index
    %17 = vector.load %arg4[%c0_8, %c0_9] : memref<64x64xf32, #tpu.memory_space<vmem>>, vector<64x64xf32>
    %cst_10 = arith.constant dense<0.000000e+00> : vector<64x128xf32>
    %18 = tpu.matmul %17, %16, %cst_10 {dimension_numbers = #tpu.dot_dimension_numbers<[1], [0], [0], [1], [0, 0, 1, 1], [], []>} : vector<64x64xf32>, vector<64x128xf32>, vector<64x128xf32> -> vector<64x128xf32>
    %c0_11 = arith.constant 0 : index
    %c0_12 = arith.constant 0 : index
    %19 = vector.load %arg5[%c0_11, %c0_12] : memref<64x1xf32, #tpu.memory_space<vmem>>, vector<64x1xf32>
    %20 = vector.broadcast %19 : vector<64x1xf32> to vector<64x128xf32>
    %21 = arith.addf %18, %20 : vector<64x128xf32>
    %cst_13 = arith.constant 2.000000e+01 : f32
    %22 = vector.broadcast %cst_13 : f32 to vector<64x128xf32>
    %23 = arith.minimumf %21, %22 : vector<64x128xf32>
    %24 = math.exp %23 : vector<64x128xf32>
    %cst_14 = arith.constant 2.000000e+00 : f32
    %25 = vector.broadcast %cst_14 : f32 to vector<64x128xf32>
    %26 = arith.addf %24, %25 : vector<64x128xf32>
    %27 = arith.mulf %24, %26 : vector<64x128xf32>
    %28 = arith.mulf %21, %27 : vector<64x128xf32>
    %cst_15 = arith.constant 2.000000e+00 : f32
    %29 = vector.broadcast %cst_15 : f32 to vector<64x128xf32>
    %30 = arith.addf %27, %29 : vector<64x128xf32>
    %31 = tpu.reciprocal %30 {approx = true} : vector<64x128xf32> -> vector<64x128xf32>
    %32 = arith.mulf %28, %31 : vector<64x128xf32>
    %c0_16 = arith.constant 0 : index
    %c0_17 = arith.constant 0 : index
    %33 = vector.load %arg6[%c0_16, %c0_17] : memref<1x64xf32, #tpu.memory_space<vmem>>, vector<1x64xf32>
    %cst_18 = arith.constant dense<0.000000e+00> : vector<1x128xf32>
    %34 = tpu.matmul %33, %32, %cst_18 {dimension_numbers = #tpu.dot_dimension_numbers<[1], [0], [0], [1], [0, 0, 1, 1], [], []>} : vector<1x64xf32>, vector<64x128xf32>, vector<1x128xf32> -> vector<1x128xf32>
    %c0_19 = arith.constant 0 : index
    %c0_20 = arith.constant 0 : index
    %35 = vector.load %arg7[%c0_19, %c0_20] : memref<1x1xf32, #tpu.memory_space<vmem>>, vector<1x1xf32>
    %36 = vector.broadcast %35 : vector<1x1xf32> to vector<1x128xf32>
    %37 = arith.addf %34, %36 : vector<1x128xf32>
    %c0_21 = arith.constant 0 : index
    %c0_22 = arith.constant 0 : index
    %38 = vector.load %arg8[%c0_21, %c0_22] : memref<1x128xf32, #tpu.memory_space<vmem>>, vector<1x128xf32>
    tpu.vector_store %arg8[%c0_21, %c0_22], %37 {strides = array<i32>} : memref<1x128xf32, #tpu.memory_space<vmem>>, vector<1x128xf32>,
    return
  }
  func.func @transform_0(%arg0: i32) -> (i32, i32) {
    %c0_i32 = arith.constant 0 : i32
    %c0_i32_0 = arith.constant 0 : i32
    return %c0_i32, %arg0 : i32, i32
  }
  func.func @transform_1(%arg0: i32) -> (i32, i32) {
    %c0_i32 = arith.constant 0 : i32
    %c0_i32_0 = arith.constant 0 : i32
    %c0_i32_1 = arith.constant 0 : i32
    return %c0_i32, %c0_i32_0 : i32, i32
  }
  func.func @transform_2(%arg0: i32) -> (i32, i32) {
    %c0_i32 = arith.constant 0 : i32
    %c0_i32_0 = arith.constant 0 : i32
    %c0_i32_1 = arith.constant 0 : i32
    return %c0_i32, %c0_i32_0 : i32, i32
  }
  func.func @transform_3(%arg0: i32) -> (i32, i32) {
    %c0_i32 = arith.constant 0 : i32
    %c0_i32_0 = arith.constant 0 : i32
    %c0_i32_1 = arith.constant 0 : i32
    return %c0_i32, %c0_i32_0 : i32, i32
  }
  func.func @transform_4(%arg0: i32) -> (i32, i32) {
    %c0_i32 = arith.constant 0 : i32
    %c0_i32_0 = arith.constant 0 : i32
    %c0_i32_1 = arith.constant 0 : i32
    return %c0_i32, %c0_i32_0 : i32, i32
  }
  func.func @transform_5(%arg0: i32) -> (i32, i32) {
    %c0_i32 = arith.constant 0 : i32
    %c0_i32_0 = arith.constant 0 : i32
    %c0_i32_1 = arith.constant 0 : i32
    return %c0_i32, %c0_i32_0 : i32, i32
  }
  func.func @transform_6(%arg0: i32) -> (i32, i32) {
    %c0_i32 = arith.constant 0 : i32
    %c0_i32_0 = arith.constant 0 : i32
    %c0_i32_1 = arith.constant 0 : i32
    return %c0_i32, %c0_i32_0 : i32, i32
  }
  func.func @transform_7(%arg0: i32) -> (i32, i32) {
    %c0_i32 = arith.constant 0 : i32
    %c0_i32_0 = arith.constant 0 : i32
    return %c0_i32, %arg0 : i32, i32
  }
}

</mosaic_0001>

<bundles_post_ra>
// kernel: critic_forward.1
= control target key start
LH: loop header
LB: loop body
LE: loop exit
PB: predicated region body
PF: predicated region fallthrough
CT: control target
= control target key end

     0   :  { %vm110_vm0 = vcmask 1042432   ;;  %vm85_vm1 = vcmask 23552   ;;  %v820_v3 = vmov 0   ;;  %vm347_vm2 = vcmask 523264   ;;  %s1047_s0 = inlined_call_operand.vmem [shape: f32[3,128], index: 0, kind: input, shape index: {}]   ;;  %s1048_s1 = inlined_call_operand.vmem [shape: f32[64,3], index: 1, kind: input, shape index: {}]   ;;  %s1049_s6 = inlined_call_operand.<no memory space> [shape: f32[1,1], index: 6, kind: input, shape index: {}]   ;;  %s1050_s2 = inlined_call_operand.vmem [shape: f32[64,1], index: 2, kind: input, shape index: {}]   ;;  %s1051_s4 = inlined_call_operand.vmem [shape: f32[64,1], index: 4, kind: input, shape index: {}]   ;;  %s1052_s3 = inlined_call_operand.vmem [shape: f32[64,64], index: 3, kind: input, shape index: {}]   ;;  %s1053_s5 = inlined_call_operand.vmem [shape: f32[1,64], index: 5, kind: input, shape index: {}]   ;;  %s1054_s7 = inlined_call_operand.vmem [shape: f32[1,128], index: 7, kind: output, shape index: {}]  }
   0x1   :  { %v28_v0 = vld [vmem:[%s1047_s0] sm:$0x7]  ;;  %v30_v2 = vld [vmem:[%s1048_s1 + $0x8] sm:$0xff]  ;;  %754 = vset.pattern.permute.xlu0 %v820_v3  ;;  %755 = vset.pattern.permute.xlu1 %v820_v3  ;;  %v12_v4 = vstv %s1049_s6  ;;  %v31_v5 = vld [vmem:[%s1048_s1 + $0x10] sm:$0xff]  ;;  %vm822_vm3 = vmmov 0  }
   0x2   :  { %v29_v1 = vld [vmem:[%s1048_s1] sm:$0xff]  ;;  %690 = vmatprep.subr.msk.mxu0 %vm110_vm0, %v28_v0  ;;  %13 = vst [vmem:[#allocation2] sm:$0x1] %v12_v4  ;;  %v44_v6 = vld [vmem:[%s1050_s2 + $0x38] sm:$0xff]  ;;  %v42_v7 = vld [vmem:[%s1050_s2 + $0x28] sm:$0xff] }
   0x3   :  { %692 = vmatprep.mubr.msk.f32.mxu0 %vm85_vm1, %v29_v1  ;;  %691 = vmatpush3.msk.msra.mxu0 %vm110_vm0, %v28_v0  ;;  %v32_v8 = vld [vmem:[%s1048_s1 + $0x18] sm:$0xff]  ;;  %v33_v9 = vld [vmem:[%s1048_s1 + $0x20] sm:$0xff]  ;;  %v43_v10 = vld [vmem:[%s1050_s2 + $0x30] sm:$0xff] }
   0x4   :  { %693 = vmatmul.mubr.msk.f32.vlgmr.msra.gmra.mxu0 %vm85_vm1, %v30_v2  ;;  %82 = vperm.xlu0 %754, %v44_v6   ;;  %v41_v11 = vld [vmem:[%s1050_s2 + $0x20] sm:$0xff]  ;;  %v34_v12 = vld [vmem:[%s1048_s1 + $0x28] sm:$0xff]  ;;  %v35_v13 = vld [vmem:[%s1048_s1 + $0x30] sm:$0xff] }
   0x5   :  { %695 = vmatprep.mubr.msk.f32.mxu0 %vm85_vm1, %v31_v5  ;;  %72 = vperm.xlu1 %755, %v42_v7   ;;  %v40_v14 = vld [vmem:[%s1050_s2 + $0x18] sm:$0xff]  ;;  %v39_v15 = vld [vmem:[%s1050_s2 + $0x10] sm:$0xff]  ;;  %v38_v17 = vld [vmem:[%s1050_s2 + $0x8] sm:$0xff] }
   0x6   :  { %v36_v16 = vld [vmem:[%s1048_s1 + $0x38] sm:$0xff]  ;;  %v37_v18 = vld [vmem:[%s1050_s2] sm:$0xff]  ;;  %v305_v20 = vld [vmem:[%s1051_s4 + $0x30] sm:$0xff] }
   0x7   :  { %v306_v19 = vld [vmem:[%s1051_s4 + $0x38] sm:$0xff]  ;;  %v304_v21 = vld [vmem:[%s1051_s4 + $0x28] sm:$0xff]  ;;  %v303_v22 = vld [vmem:[%s1051_s4 + $0x20] sm:$0xff] }
   0x8   :  { %696 = vmatmul.mubr.msk.f32.gmra.mxu0 %vm85_vm1, %v32_v8  ;;  %77 = vperm.xlu0 %754, %v43_v10   ;;  %v302_v23 = vld [vmem:[%s1051_s4 + $0x18] sm:$0xff]  ;;  %v301_v24 = vld [vmem:[%s1051_s4 + $0x10] sm:$0xff]  ;;  %v300_v25 = vld [vmem:[%s1051_s4 + $0x8] sm:$0xff] }
   0x9   :  { %698 = vmatprep.mubr.msk.f32.mxu0 %vm85_vm1, %v33_v9  ;;  %67 = vperm.xlu1 %755, %v41_v11   ;;  %v299_v26 = vld [vmem:[%s1051_s4] sm:$0xff] }
   0xa   :  { %v550_v27 = vld [vmem:[#allocation2] sm:$0x1] }
   0xb   :  { %v291_v28 = vld [vmem:[%s1052_s3] sm:$0xff] }
   0xc   :  { %699 = vmatmul.mubr.msk.f32.gmra.mxu0 %vm85_vm1, %v34_v12  ;;  %62 = vperm.xlu0 %754, %v40_v14  }
   0xd   :  { %701 = vmatprep.mubr.msk.f32.mxu0 %vm85_vm1, %v35_v13  ;;  %57 = vperm.xlu1 %755, %v39_v15  }
   0xe   :  { %720 = vmatprep.mubr.msk.f32.mxu1 %vm347_vm2, %v291_v28 }
  0x10   :  { %702 = vmatmul.mubr.msk.f32.gmra.mxu0 %vm85_vm1, %v36_v16  ;;  %52 = vperm.xlu0 %754, %v38_v17  }
  0x11   :  { %47 = vperm.xlu1 %755, %v37_v18  }
  0x14   :  { %344 = vperm.xlu0 %754, %v306_v19  }
  0x15   :  { %339 = vperm.xlu1 %755, %v305_v20  }
  0x18   :  { %334 = vperm.xlu0 %754, %v304_v21  }
  0x19   :  { %329 = vperm.xlu1 %755, %v303_v22  }
  0x1c   :  { %324 = vperm.xlu0 %754, %v302_v23  }
  0x1d   :  { %319 = vperm.xlu1 %755, %v301_v24  }
  0x20   :  { %314 = vperm.xlu0 %754, %v300_v25  }
  0x21   :  { %309 = vperm.xlu1 %755, %v299_v26  }
  0x24   :  { %553 = vperm.xlu0 %754, %v550_v27  }
  0x7f   :  { %v83_v29 = vpop.permute.xlu0 %82 }
  0x80   :  { %v73_v30 = vpop.permute.xlu1 %72 }
  0x83   :  { %v78_v31 = vpop.permute.xlu0 %77 }
  0x84   :  { %v68_v32 = vpop.permute.xlu1 %67 }
  0x87   :  { %v63_v35 = vpop.permute.xlu0 %62 }
  0x88   :  { %v58_v37 = vpop.permute.xlu1 %57 }
  0x8b   :  { %v53_v42 = vpop.permute.xlu0 %52 }
  0x8c   :  { %v48_v47 = vpop.permute.xlu1 %47 }
  0xc4   :  { %v694_v33 = vpop.f32.mrf.mxu0 }
  0xc5   :  { %v961_v44 = vadd.f32 %v694_v33, %v53_v42 }
  0xc6   :  { %v180_v34 = vpop.f32.mrf.mxu0 }
  0xc7   :  { %v967_v50 = vadd.f32 %v180_v34, %v48_v47  ;;  %v220_v56 = vmin.f32 %v961_v44, 20.0 }
  0xc8   :  { %v697_v36 = vpop.f32.mrf.mxu0 }
  0xc9   :  { %v955_v38 = vadd.f32 %v697_v36, %v63_v35  ;;  %v219_v62 = vmin.f32 %v967_v50, 20.0  ;;  %v229_v2 = vmul.f32 1.442695, %v220_v56 }
  0xca   :  { %v190_v39 = vpop.f32.mrf.mxu0 }
  0xcb   :  { %v957_v40 = vadd.f32 %v190_v39, %v58_v37  ;;  %v222_v45 = vmin.f32 %v955_v38, 20.0  ;;  %v227_v4 = vmul.f32 1.442695, %v219_v62 }
  0xcc   :  { %v700_v41 = vpop.f32.mrf.mxu0 }
  0xcd   :  { %v959_v43 = vadd.f32 %v700_v41, %v73_v30  ;;  %v221_v51 = vmin.f32 %v957_v40, 20.0  ;;  %v233_v57 = vmul.f32 1.442695, %v222_v45 }
  0xce   :  { %v200_v46 = vpop.f32.mrf.mxu0 }
  0xcf   :  { %v224_v48 = vmin.f32 %v959_v43, 20.0  ;;  %v965_v49 = vadd.f32 %v200_v46, %v68_v32  ;;  %v231_v63 = vmul.f32 1.442695, %v221_v51 }
  0xd0   :  { %v703_v52 = vpop.f32.mrf.mxu0 }
  0xd1   :  { %v237_v53 = vmul.f32 1.442695, %v224_v48  ;;  %v223_v54 = vmin.f32 %v965_v49, 20.0  ;;  %v216_v55 = vadd.f32 %v703_v52, %v83_v29 }
  0xd2   :  { %v210_v58 = vpop.f32.mrf.mxu0 }
  0xd3   :  { %756 = vpow2.f32 %v237_v53  ;;  %v235_v59 = vmul.f32 1.442695, %v223_v54  ;;  %v226_v60 = vmin.f32 %v216_v55, 20.0  ;;  %v211_v61 = vadd.f32 %v210_v58, %v78_v31 }
  0xd5   :  { %758 = vpow2.f32 %v235_v59  ;;  %v241_v0 = vmul.f32 1.442695, %v226_v60  ;;  %v225_v1 = vmin.f32 %v211_v61, 20.0 }
  0xd6   :  { %760 = vpow2.f32 %v233_v57 }
  0xd7   :  { %762 = vpow2.f32 %v241_v0  ;;  %v239_v3 = vmul.f32 1.442695, %v225_v1  ;;  %v295_v0 = vld [vmem:[%s1052_s3 + $0x20] sm:$0xff]  ;;  %v296_v1 = vld [vmem:[%s1052_s3 + $0x28] sm:$0xff] }
  0xd8   :  { %764 = vpow2.f32 %v231_v63 }
  0xd9   :  { %766 = vpow2.f32 %v239_v3  ;;  %v298_v3 = vld [vmem:[%s1052_s3 + $0x38] sm:$0xff] }
  0xda   :  { %768 = vpow2.f32 %v229_v2  ;;  %v297_v2 = vld [vmem:[%s1052_s3 + $0x30] sm:$0xff] }
  0xdb   :  { %770 = vpow2.f32 %v227_v4  ;;  %v821_v4 = vmov 0.0  }
  0xdc   :  { %732 = vmatprep.subr.mxu0 %v821_v4  ;;  %748 = vmatprep.mubr.msk.f32.mxu0 %vm822_vm3, %v821_v4 }
  0xe0   :  { %v757_v5 = vpop.eup %756 }
  0xe1   :  { %v248_v6 = vadd.f32 2.0, %v757_v5 }
  0xe2   :  { %v759_v7 = vpop.eup %758 }
  0xe3   :  { %v761_v8 = vpop.eup %760  ;;  %v247_v10 = vadd.f32 2.0, %v759_v7  ;;  %v256_v12 = vmul.f32 %v757_v5, %v248_v6  ;;  %v345_v5 = vpop.permute.xlu0 %344 }
  0xe4   :  { %v763_v9 = vpop.eup %762  ;;  %v246_v15 = vadd.f32 2.0, %v761_v8  ;;  %v340_v6 = vpop.permute.xlu1 %339 }
  0xe5   :  { %v765_v11 = vpop.eup %764  ;;  %v250_v13 = vadd.f32 2.0, %v763_v9  ;;  %v255_v19 = vmul.f32 %v759_v7, %v247_v10  ;;  %v272_v22 = vadd.f32 2.0, %v256_v12  ;;  %v264_v47 = vmul.f32 %v256_v12, %v959_v43 }
  0xe6   :  { %v767_v14 = vpop.eup %766  ;;  %v245_v18 = vadd.f32 2.0, %v765_v11  ;;  %v254_v25 = vmul.f32 %v761_v8, %v246_v15 }
  0xe7   :  { %v769_v16 = vpop.eup %768  ;;  %v258_v17 = vmul.f32 %v763_v9, %v250_v13  ;;  %v249_v20 = vadd.f32 2.0, %v767_v14  ;;  %v271_v29 = vadd.f32 2.0, %v255_v19  ;;  %v263_v52 = vmul.f32 %v255_v19, %v965_v49  ;;  %v335_v7 = vpop.permute.xlu0 %334 }
  0xe8   :  { %v771_v21 = vpop.eup %770  ;;  %v244_v24 = vadd.f32 2.0, %v769_v16  ;;  %v253_v28 = vmul.f32 %v765_v11, %v245_v18  ;;  %v270_v32 = vadd.f32 2.0, %v254_v25  ;;  %v330_v8 = vpop.permute.xlu1 %329 }
  0xe9   :  { %v274_v23 = vadd.f32 2.0, %v258_v17  ;;  %v257_v26 = vmul.f32 %v767_v14, %v249_v20  ;;  %v243_v27 = vadd.f32 2.0, %v771_v21  ;;  %v266_v37 = vmul.f32 %v258_v17, %v216_v55 }
  0xea   :  { %v252_v31 = vmul.f32 %v769_v16, %v244_v24  ;;  %v269_v34 = vadd.f32 2.0, %v253_v28  ;;  %v262_v55 = vmul.f32 %v254_v25, %v955_v38  ;;  %v261_v58 = vmul.f32 %v253_v28, %v957_v40  ;;  %v292_v40 = vld [vmem:[%s1052_s3 + $0x8] sm:$0xff] }
  0xeb   :  { %772 = vrcp.f32 %v274_v23  ;;  %v273_v30 = vadd.f32 2.0, %v257_v26  ;;  %v251_v33 = vmul.f32 %v771_v21, %v243_v27  ;;  %v265_v45 = vmul.f32 %v257_v26, %v211_v61  ;;  %v325_v11 = vpop.permute.xlu0 %324 }
  0xec   :  { %774 = vrcp.f32 %v272_v22  ;;  %v268_v35 = vadd.f32 2.0, %v252_v31  ;;  %v260_v60 = vmul.f32 %v252_v31, %v961_v44  ;;  %v293_v44 = vld [vmem:[%s1052_s3 + $0x10] sm:$0xff]  ;;  %v320_v13 = vpop.permute.xlu1 %319 }
  0xed   :  { %776 = vrcp.f32 %v273_v30  ;;  %v267_v36 = vadd.f32 2.0, %v251_v33  ;;  %v259_v62 = vmul.f32 %v251_v33, %v967_v50  ;;  %v294_v50 = vld [vmem:[%s1052_s3 + $0x18] sm:$0xff] }
  0xee   :  { %778 = vrcp.f32 %v271_v29 }
  0xef   :  { %780 = vrcp.f32 %v270_v32  ;;  %v315_v18 = vpop.permute.xlu0 %314 }
  0xf0   :  { %782 = vrcp.f32 %v269_v34  ;;  %v310_v23 = vpop.permute.xlu1 %309 }
  0xf1   :  { %784 = vrcp.f32 %v268_v35 }
  0xf2   :  { %786 = vrcp.f32 %v267_v36 }
  0xf8   :  { %v773_v39 = vpop.eup %772 }
  0xf9   :  { %v290_v41 = vmul.f32 %v773_v39, %v266_v37  ;;  %v775_v42 = vpop.eup %774 }
  0xfa   :  { %v777_v46 = vpop.eup %776  ;;  %v288_v53 = vmul.f32 %v775_v42, %v264_v47 }
  0xfb   :  { %704 = vmatprep.subr.mxu1 %v290_v41  ;;  %v289_v48 = vmul.f32 %v777_v46, %v265_v45  ;;  %v779_v51 = vpop.eup %778 }
  0xfc   :  { %705 = vmatpush3.msra.mxu1 %v290_v41  ;;  %v781_v54 = vpop.eup %780  ;;  %v287_v56 = vmul.f32 %v779_v51, %v263_v52 }
  0xfd   :  { %706 = vmatprep.subr.mxu1 %v289_v48  ;;  %v783_v57 = vpop.eup %782  ;;  %v286_v59 = vmul.f32 %v781_v54, %v262_v55 }
  0xfe   :  { %707 = vmatpush3.msra.mxu1 %v289_v48  ;;  %v785_v43 = vpop.eup %784  ;;  %v285_v49 = vmul.f32 %v783_v57, %v261_v58 }
  0xff   :  { %708 = vmatprep.subr.mxu1 %v288_v53  ;;  %v787_v61 = vpop.eup %786  ;;  %v284_v38 = vmul.f32 %v785_v43, %v260_v60 }
 0x100   :  { %709 = vmatpush3.msra.mxu1 %v288_v53  ;;  %v283_v63 = vmul.f32 %v787_v61, %v259_v62 }
 0x101   :  { %710 = vmatprep.subr.mxu1 %v287_v56 }
 0x102   :  { %711 = vmatpush3.msra.mxu1 %v287_v56 }
 0x103   :  { %712 = vmatprep.subr.mxu1 %v286_v59 }
 0x104   :  { %713 = vmatpush3.msra.mxu1 %v286_v59 }
 0x105   :  { %714 = vmatprep.subr.mxu1 %v285_v49 }
 0x106   :  { %715 = vmatpush3.msra.mxu1 %v285_v49 }
 0x107   :  { %716 = vmatprep.subr.mxu1 %v284_v38 }
 0x108   :  { %717 = vmatpush3.msra.mxu1 %v284_v38 }
 0x109   :  { %718 = vmatprep.subr.mxu1 %v283_v63 }
 0x10a   :  { %719 = vmatpush3.msra.mxu1 %v283_v63 }
 0x10b   :  { %721 = vmatmul.mubr.msk.f32.vlgmr.msra.gmra.mxu1 %vm347_vm2, %v292_v40 }
 0x10c   :  { %723 = vmatprep.mubr.msk.f32.mxu1 %vm347_vm2, %v293_v44 }
 0x10f   :  { %724 = vmatmul.mubr.msk.f32.gmra.mxu1 %vm347_vm2, %v294_v50 }
 0x110   :  { %726 = vmatprep.mubr.msk.f32.mxu1 %vm347_vm2, %v295_v0 }
 0x113   :  { %727 = vmatmul.mubr.msk.f32.gmra.mxu1 %vm347_vm2, %v296_v1 }
 0x114   :  { %729 = vmatprep.mubr.msk.f32.mxu1 %vm347_vm2, %v297_v2 }
 0x117   :  { %730 = vmatmul.mubr.msk.f32.gmra.mxu1 %vm347_vm2, %v298_v3 }
 0x1cb   :  { %v722_v9 = vpop.f32.mrf.mxu1 }
 0x1cc   :  { %v1015_v20 = vadd.f32 %v722_v9, %v315_v18 }
 0x1cd   :  { %v438_v10 = vpop.f32.mrf.mxu1 }
 0x1ce   :  { %v1021_v26 = vadd.f32 %v438_v10, %v310_v23  ;;  %v478_v32 = vmin.f32 %v1015_v20, 20.0 }
 0x1cf   :  { %v725_v12 = vpop.f32.mrf.mxu1 }
 0x1d0   :  { %v1009_v14 = vadd.f32 %v725_v12, %v325_v11  ;;  %v477_v39 = vmin.f32 %v1021_v26, 20.0  ;;  %v487_v46 = vmul.f32 1.442695, %v478_v32 }
 0x1d1   :  { %v448_v15 = vpop.f32.mrf.mxu1 }
 0x1d2   :  { %v1011_v16 = vadd.f32 %v448_v15, %v320_v13  ;;  %v480_v21 = vmin.f32 %v1009_v14, 20.0  ;;  %v485_v48 = vmul.f32 1.442695, %v477_v39 }
 0x1d3   :  { %v728_v17 = vpop.f32.mrf.mxu1 }
 0x1d4   :  { %v1013_v19 = vadd.f32 %v728_v17, %v335_v7  ;;  %v479_v27 = vmin.f32 %v1011_v16, 20.0  ;;  %v491_v33 = vmul.f32 1.442695, %v480_v21 }
 0x1d5   :  { %v458_v22 = vpop.f32.mrf.mxu1 }
 0x1d6   :  { %v482_v24 = vmin.f32 %v1013_v19, 20.0  ;;  %v1019_v25 = vadd.f32 %v458_v22, %v330_v8  ;;  %v489_v41 = vmul.f32 1.442695, %v479_v27 }
 0x1d7   :  { %v731_v28 = vpop.f32.mrf.mxu1 }
 0x1d8   :  { %v495_v29 = vmul.f32 1.442695, %v482_v24  ;;  %v481_v30 = vmin.f32 %v1019_v25, 20.0  ;;  %v474_v31 = vadd.f32 %v731_v28, %v345_v5 }
 0x1d9   :  { %v468_v34 = vpop.f32.mrf.mxu1 }
 0x1da   :  { %788 = vpow2.f32 %v495_v29  ;;  %v493_v35 = vmul.f32 1.442695, %v481_v30  ;;  %v484_v36 = vmin.f32 %v474_v31, 20.0  ;;  %v469_v37 = vadd.f32 %v468_v34, %v340_v6 }
 0x1dc   :  { %790 = vpow2.f32 %v493_v35  ;;  %v499_v42 = vmul.f32 1.442695, %v484_v36  ;;  %v483_v45 = vmin.f32 %v469_v37, 20.0 }
 0x1dd   :  { %792 = vpow2.f32 %v491_v33 }
 0x1de   :  { %794 = vpow2.f32 %v499_v42  ;;  %v497_v47 = vmul.f32 1.442695, %v483_v45 }
 0x1df   :  { %796 = vpow2.f32 %v489_v41 }
 0x1e0   :  { %798 = vpow2.f32 %v497_v47  ;;  %v554_v47 = vpop.permute.xlu0 %553 }
 0x1e1   :  { %800 = vpow2.f32 %v487_v46 }
 0x1e2   :  { %802 = vpow2.f32 %v485_v48 }
 0x1e7   :  { %v789_v51 = vpop.eup %788 }
 0x1e8   :  { %v506_v52 = vadd.f32 2.0, %v789_v51 }
 0x1e9   :  { %v791_v53 = vpop.eup %790 }
 0x1ea   :  { %v793_v54 = vpop.eup %792  ;;  %v505_v56 = vadd.f32 2.0, %v791_v53  ;;  %v514_v58 = vmul.f32 %v789_v51, %v506_v52 }
 0x1eb   :  { %v795_v55 = vpop.eup %794  ;;  %v504_v60 = vadd.f32 2.0, %v793_v54 }
 0x1ec   :  { %v797_v57 = vpop.eup %796  ;;  %v508_v59 = vadd.f32 2.0, %v795_v55  ;;  %v513_v38 = vmul.f32 %v791_v53, %v505_v56  ;;  %v530_v44 = vadd.f32 2.0, %v514_v58  ;;  %v522_v24 = vmul.f32 %v514_v58, %v1013_v19 }
 0x1ed   :  { %v799_v43 = vpop.eup %798  ;;  %v503_v62 = vadd.f32 2.0, %v797_v57  ;;  %v512_v1 = vmul.f32 %v793_v54, %v504_v60 }
 0x1ee   :  { %v801_v49 = vpop.eup %800  ;;  %v516_v61 = vmul.f32 %v795_v55, %v508_v59  ;;  %v507_v63 = vadd.f32 2.0, %v799_v43  ;;  %v529_v6 = vadd.f32 2.0, %v513_v38  ;;  %v521_v30 = vmul.f32 %v513_v38, %v1019_v25 }
 0x1ef   :  { %v803_v40 = vpop.eup %802  ;;  %v502_v0 = vadd.f32 2.0, %v801_v49  ;;  %v511_v5 = vmul.f32 %v797_v57, %v503_v62  ;;  %v528_v9 = vadd.f32 2.0, %v512_v1 }
 0x1f0   :  { %v532_v50 = vadd.f32 2.0, %v516_v61  ;;  %v515_v2 = vmul.f32 %v799_v43, %v507_v63  ;;  %v501_v3 = vadd.f32 2.0, %v803_v40  ;;  %v524_v15 = vmul.f32 %v516_v61, %v474_v31 }
 0x1f1   :  { %v510_v8 = vmul.f32 %v801_v49, %v502_v0  ;;  %v527_v11 = vadd.f32 2.0, %v511_v5  ;;  %v520_v31 = vmul.f32 %v512_v1, %v1009_v14  ;;  %v519_v19 = vmul.f32 %v511_v5, %v1011_v16  ;;  %v549_v16 = vld [vmem:[%s1053_s5] sm:$0x1] }
 0x1f2   :  { %804 = vrcp.f32 %v532_v50  ;;  %v531_v7 = vadd.f32 2.0, %v515_v2  ;;  %v509_v10 = vmul.f32 %v803_v40, %v501_v3  ;;  %v523_v22 = vmul.f32 %v515_v2, %v469_v37 }
 0x1f3   :  { %806 = vrcp.f32 %v530_v44  ;;  %v526_v12 = vadd.f32 2.0, %v510_v8  ;;  %v518_v25 = vmul.f32 %v510_v8, %v1015_v20  ;;  %v556_v20 = vlaneseq }
 0x1f4   :  { %808 = vrcp.f32 %v531_v7  ;;  %v525_v13 = vadd.f32 2.0, %v509_v10  ;;  %v517_v41 = vmul.f32 %v509_v10, %v1021_v26 }
 0x1f5   :  { %810 = vrcp.f32 %v529_v6  ;;  %v557_v45 = vshrl.u32 %v556_v20, 7 }
 0x1f6   :  { %812 = vrcp.f32 %v528_v9 }
 0x1f7   :  { %814 = vrcp.f32 %v527_v11  ;;  %v558_v46 = vsub.s32 0, %v557_v45 }
 0x1f8   :  { %816 = vrcp.f32 %v526_v12 }
 0x1f9   :  { %818 = vrcp.f32 %v525_v13  ;;  %v559_v48 = vrot.slane %v554_v47, %v558_v46 }
 0x1ff   :  { %v805_v17 = vpop.eup %804 }
 0x200   :  { %v548_v18 = vmul.f32 %v805_v17, %v524_v15  ;;  %v807_v21 = vpop.eup %806 }
 0x201   :  { %v809_v23 = vpop.eup %808  ;;  %v546_v29 = vmul.f32 %v807_v21, %v522_v24 }
 0x202   :  { %733 = vmatpush3.msra.mxu0 %v548_v18  ;;  %v547_v27 = vmul.f32 %v809_v23, %v523_v22  ;;  %v811_v28 = vpop.eup %810 }
 0x203   :  { %734 = vmatprep.subr.mxu0 %v821_v4  ;;  %v813_v32 = vpop.eup %812  ;;  %v545_v33 = vmul.f32 %v811_v28, %v521_v30 }
 0x204   :  { %735 = vmatpush3.msra.mxu0 %v547_v27  ;;  %v815_v34 = vpop.eup %814  ;;  %v544_v35 = vmul.f32 %v813_v32, %v520_v31 }
 0x205   :  { %736 = vmatprep.subr.mxu0 %v821_v4  ;;  %v817_v36 = vpop.eup %816  ;;  %v543_v37 = vmul.f32 %v815_v34, %v519_v19 }
 0x206   :  { %737 = vmatpush3.msra.mxu0 %v546_v29  ;;  %v819_v39 = vpop.eup %818  ;;  %v542_v14 = vmul.f32 %v817_v36, %v518_v25 }
 0x207   :  { %738 = vmatprep.subr.mxu0 %v821_v4  ;;  %v541_v42 = vmul.f32 %v819_v39, %v517_v41 }
 0x208   :  { %739 = vmatpush3.msra.mxu0 %v545_v33 }
 0x209   :  { %740 = vmatprep.subr.mxu0 %v821_v4 }
 0x20a   :  { %741 = vmatpush3.msra.mxu0 %v544_v35 }
 0x20b   :  { %742 = vmatprep.subr.mxu0 %v821_v4 }
 0x20c   :  { %743 = vmatpush3.msra.mxu0 %v543_v37 }
 0x20d   :  { %744 = vmatprep.subr.mxu0 %v821_v4 }
 0x20e   :  { %745 = vmatpush3.msra.mxu0 %v542_v14 }
 0x20f   :  { %746 = vmatprep.subr.mxu0 %v821_v4 }
 0x210   :  { %747 = vmatpush3.msra.mxu0 %v541_v42 }
 0x211   :  { %749 = vmatmul.mubr.msk.f32.vlgmr.msra.gmra.mxu0 %vm347_vm2, %v549_v16 }
 0x2d1   :  { %v629_v26 = vpop.f32.mrf.mxu0 }
 0x2d2   :  { %v630_v51 = vadd.f32 %v629_v26, %v559_v48 }
 0x2d3   :  { %v750_v52 = vpop.f32.mrf.mxu0 }
 0x2d4   :  { %633 = vst [vmem:[%s1054_s7] sm:$0x1] %v630_v51 }

</bundles_post_ra>
